<compile_context>
chip_gen: v7x
topology: tpu7x:2x2x1
jax: 0.10.0
libtpu: 0.0.40
codegen_flags: <defaults>
</compile_context>

<pallas_src>
import math
import functools

import jax
import jax.numpy as jnp
from jax.experimental import pallas as pl
from jax.experimental.pallas import tpu as pltpu


# ----------------------------- kernels --------------------------------------

def _pe_add_kernel(x_ref, pe_ref, o_ref):
    # x_ref: (TS, B, D) tile; pe_ref: (TS, D) tile broadcast over the batch axis.
    o_ref[...] = x_ref[...] + pe_ref[...][:, None, :]


def _pe_add_dropout_kernel(x_ref, pe_ref, bits_ref, o_ref, *, threshold, scale):
    # Inverted dropout with an exact integer threshold compare on uint32 bits.
    y = x_ref[...] + pe_ref[...][:, None, :]
    keep = bits_ref[...] >= jnp.uint32(threshold)
    o_ref[...] = jnp.where(keep, y * scale, jnp.zeros_like(y)).astype(o_ref.dtype)


# ----------------------------- setup / wrapper -------------------------------

def make_positional_encoding_table(d_model, max_len=5000, dtype=jnp.float32):
    """Deterministic sin/cos table, identical to the PyTorch __init__ buffer."""
    position = jnp.arange(max_len, dtype=jnp.float32)[:, None]                 # (max_len, 1)
    div_term = jnp.exp(
        jnp.arange(0, d_model, 2, dtype=jnp.float32) * (-math.log(10000.0) / d_model)
    )                                                                           # (d_model//2,)
    ang = position * div_term                                                   # (max_len, d_model//2)
    pe = jnp.zeros((max_len, d_model), dtype=jnp.float32)
    pe = pe.at[:, 0::2].set(jnp.sin(ang))
    pe = pe.at[:, 1::2].set(jnp.cos(ang))
    return pe.astype(dtype)                                                     # (max_len, d_model)


def _default_block_rows(S, B, D, itemsize, target_bytes=2 * 1024 * 1024):
    """Pick an S-tile so each x block is ~2 MiB, multiple of 8, capped by S."""
    bytes_per_row = max(1, B * D * itemsize)
    rows = max(8, (target_bytes // bytes_per_row) // 8 * 8)
    rows = min(rows, max(8, ((S + 7) // 8) * 8))
    return int(rows)


def positional_encoding_forward(x, pe, *, p=0.1, training=False, rng=None,
                                block_rows=None):
    """x: (seq, batch, d_model); pe: (max_len, d_model). Returns x-shaped/typed."""
    S, B, D = x.shape
    pe = pe.astype(x.dtype)                      # avoid per-element promote/downcast
    if block_rows is None:
        block_rows = _default_block_rows(S, B, D, jnp.dtype(x.dtype).itemsize)
    TS = int(block_rows)

    grid = (pl.cdiv(S, TS),)
    x_spec = pl.BlockSpec((TS, B, D), lambda i: (i, 0, 0))
    pe_spec = pl.BlockSpec((TS, D), lambda i: (i, 0))      # selects the S-tile of pe
    out_spec = pl.BlockSpec((TS, B, D), lambda i: (i, 0, 0))
    out_shape = jax.ShapeDtypeStruct((S, B, D), x.dtype)
    cparams = pltpu.CompilerParams(dimension_semantics=("parallel",))

    if training and p > 0.0:
        if rng is None:
            rng = jax.random.PRNGKey(0)
        # Host-side random bits (works on all backends); exact integer threshold.
        bits = jax.random.bits(rng, (S, B, D), dtype=jnp.uint32)
        threshold = min(int(round(p * (2 ** 32))), 2 ** 32 - 1)   # drop iff bits < threshold
        scale = 1.0 / (1.0 - p)
        kernel = functools.partial(_pe_add_dropout_kernel,
                                   threshold=threshold, scale=scale)
        return pl.pallas_call(
            kernel,
            out_shape=out_shape,
            grid=grid,
            in_specs=[x_spec, pe_spec, pl.BlockSpec((TS, B, D), lambda i: (i, 0, 0))],
            out_specs=out_spec,
            compiler_params=cparams,
        )(x, pe, bits)

    return pl.pallas_call(
        _pe_add_kernel,
        out_shape=out_shape,
        grid=grid,
        in_specs=[x_spec, pe_spec],
        out_specs=out_spec,
        compiler_params=cparams,
    )(x, pe)


# ----------------------------- demo / check ----------------------------------

if __name__ == "__main__":
    # RepNet's TransEncoder uses PositionalEncoding(d_model=512, dropout=0.1, max_len=64).
    SEQ, BATCH, D_MODEL, MAX_LEN = 16, 2, 512, 64

    key = jax.random.PRNGKey(0)
    kx, kd = jax.random.split(key)
    x = jax.random.normal(kx, (SEQ, BATCH, D_MODEL), dtype=jnp.float32)
    pe = make_positional_encoding_table(D_MODEL, max_len=MAX_LEN)

    # Eval-mode forward (dropout is identity); block_rows=8 forces a 2-step grid
    # so the tiled/pipelined path is actually exercised at this small shape.
    out = positional_encoding_forward(x, pe, p=0.1, training=False, block_rows=8)
    out = jax.block_until_ready(out)

    ref = x + pe[:SEQ, None, :]
    assert out.shape == x.shape and out.dtype == x.dtype
    assert jnp.allclose(out, ref, atol=1e-6, rtol=1e-6)

    # Training path: every output element is either 0 (dropped) or ref/(1-p).
    p = 0.1
    out_train = jax.block_until_ready(
        positional_encoding_forward(x, pe, p=p, training=True, rng=kd, block_rows=8)
    )
    assert out_train.shape == x.shape and out_train.dtype == x.dtype
    scaled = ref / (1.0 - p)
    ok = jnp.isclose(out_train, scaled, atol=1e-5, rtol=1e-5) | (out_train == 0.0)
    assert bool(jnp.all(ok))

    print("KERNEL_OK")
</pallas_src>

<mosaic_0001>
module attributes {stable_mosaic.version = 11 : i64} {
  func.func @_pe_add_kernel(%arg0: i32, %arg1: memref<8x2x512xf32, #tpu.memory_space<vmem>>, %arg2: memref<8x512xf32, #tpu.memory_space<vmem>>, %arg3: memref<8x2x512xf32, #tpu.memory_space<vmem>>) attributes {dimension_semantics = [#tpu.dimension_semantics<parallel>], iteration_bounds = array<i64: 2>, scalar_prefetch = 0 : i64, scratch_operands = 0 : i64, tpu.core_type = #tpu.core_type<tc>, window_params = [{transform_indices = @transform_0, window_bounds = array<i64: 8, 2, 512>}, {transform_indices = @transform_1, window_bounds = array<i64: 8, 512>}, {transform_indices = @transform_2, window_bounds = array<i64: 8, 2, 512>}]} {
    %c0 = arith.constant 0 : index
    %c0_0 = arith.constant 0 : index
    %c0_1 = arith.constant 0 : index
    %0 = vector.load %arg1[%c0, %c0_0, %c0_1] : memref<8x2x512xf32, #tpu.memory_space<vmem>>, vector<8x2x512xf32>
    %c0_2 = arith.constant 0 : index
    %c0_3 = arith.constant 0 : index
    %1 = vector.load %arg2[%c0_2, %c0_3] : memref<8x512xf32, #tpu.memory_space<vmem>>, vector<8x512xf32>
    %2 = vector.shape_cast %1 : vector<8x512xf32> to vector<8x1x512xf32>
    %3 = vector.broadcast %2 : vector<8x1x512xf32> to vector<8x2x512xf32>
    %4 = arith.addf %0, %3 : vector<8x2x512xf32>
    %c0_4 = arith.constant 0 : index
    %c0_5 = arith.constant 0 : index
    %c0_6 = arith.constant 0 : index
    %5 = vector.load %arg3[%c0_4, %c0_5, %c0_6] : memref<8x2x512xf32, #tpu.memory_space<vmem>>, vector<8x2x512xf32>
    tpu.vector_store %arg3[%c0_4, %c0_5, %c0_6], %4 {strides = array<i32>} : memref<8x2x512xf32, #tpu.memory_space<vmem>>, vector<8x2x512xf32>,
    return
  }
  func.func @transform_0(%arg0: i32) -> (i32, i32, i32) {
    %c0_i32 = arith.constant 0 : i32
    %c0_i32_0 = arith.constant 0 : i32
    %c0_i32_1 = arith.constant 0 : i32
    return %arg0, %c0_i32, %c0_i32_0 : i32, i32, i32
  }
  func.func @transform_1(%arg0: i32) -> (i32, i32) {
    %c0_i32 = arith.constant 0 : i32
    %c0_i32_0 = arith.constant 0 : i32
    return %arg0, %c0_i32 : i32, i32
  }
  func.func @transform_2(%arg0: i32) -> (i32, i32, i32) {
    %c0_i32 = arith.constant 0 : i32
    %c0_i32_0 = arith.constant 0 : i32
    %c0_i32_1 = arith.constant 0 : i32
    return %arg0, %c0_i32, %c0_i32_0 : i32, i32, i32
  }
}

</mosaic_0001>

<bundles_post_ra>
// kernel: tpu_custom_call.1
= control target key start
LH: loop header
LB: loop body
LE: loop exit
PB: predicated region body
PF: predicated region fallthrough
CT: control target
= control target key end

     0   :  { %7 = vsyncpa [#allocation3], 0  ;;  %s1217_s0 = inlined_call_operand.hbm [shape: f32[16,2,512], index: 0, kind: input, shape index: {}]   ;;  %s1218_s1 = inlined_call_operand.hbm [shape: f32[64,512], index: 1, kind: input, shape index: {}]   ;;  %s1219_s2 = inlined_call_operand.hbm [shape: f32[16,2,512], index: 2, kind: output, shape index: {}]  }
   0x1   :  { %9 = vsyncpa [#allocation3 + $0x1], 0 }
   0x2   :  { %10 = vsyncpa [#allocation6], 0 }
   0x3   :  { %12 = vsyncpa [#allocation6 + $0x1], 0 }
   0x4   :  { %13 = vsyncpa [#allocation4], 0 }
   0x5   :  { %15 = vsyncpa [#allocation4 + $0x1], 0  ;;  %s930_s9 = smov 0   ;;  %s932_s10 = smov 0  }
   0x6   :  { %s934_s11 = smov 0   ;;  %s936_s12 = smov 0  }
   0x7 LB: > { %s951_s13 = sadd.s32 4294967295, %s904_s12   ;;  %s686_s14 = sadd.s32 4294967294, %s904_s12   ;;  %s904_s12 = sphi %s936_s12, %s1236_s12   ;;  %s900_s11 = sphi %s934_s11, %s1235_s11   ;;  %s896_s10 = sphi %s932_s10, %s1234_s10   ;;  %s892_s9 = sphi %s930_s9, %s1233_s9  }
   0x8   : > { %s955_s15 = sadd.s32 1, %s904_s12   ;;  %s28_s16 = sadd.s32 1, %s900_s11 }
   0x9   : > { %s25_s17 = ssub.s32 %s904_s12, %s955_s15  ;;  %p35_p0 = scmp.ne.s32.totalorder %s900_s11, %s896_s10 }
   0xa   : > { %p26_p1 = scmp.eq.s32.totalorder %s25_s17, 0  ;;  %p36_p2 = scmp.eq.s32.totalorder %s904_s12, 0 }
   0xb   : > { %p41_p3 = scmp.ne.s32.totalorder %s896_s10, %s892_s9  ;;  %p42_p4 = scmp.eq.s32.totalorder %s951_s13, 0 }
   0xc   : > { %s967_s18 = scalar_select %p26_p1, %s900_s11, %s28_s16  }
   0xd   : > { %p969_p5 = por %p36_p2, %p35_p0  ;;  %p973_p6 = por %p42_p4, %p41_p3 }
   0xe   : > { %p91_p7 = scmp.eq.s32.totalorder %s951_s13, 1  ;;  %p97_p8 = scmp.eq.s32.totalorder %s686_s14, 1 }
   0xf   : > { %s1223_s20 = scalar_select %p973_p6, 1, 0 }
  0x10   : > { %p728_p10 = scmp.lt.s32.totalorder %s904_s12, 2  ;;  %p980_p11 = por %p91_p7, %p35_p0 }
  0x11   : > { %p984_p12 = por %p97_p8, %p41_p3  ;;  %s989_s23 = sand.u32 1, %s900_s11  }
  0x12   : > { %s1224_s21 = scalar_select %p980_p11, 1, 0 }
  0x13   : > { %s1225_s22 = scalar_select %p984_p12, 1, 0 }
  0x14   : > { %s707_s24 = sshll.u32 %s904_s12, 10  ;;  %s689_s25 = sshll.u32 %s989_s23, 6 }
  0x15   : > { %s996_s28 = scalar_lea.hbm %s1217_s0, %s707_s24  ;;  %s121_s29 = scalar_lea.vmem [#allocation2], %s689_s25 }
  0x16   : > { %s129_s30 = sshll.u32 %s121_s29, 4  ;;  %p1000_p13 = pnand %p728_p10, %p969_p5  ;;  %s1004_s30 = int_to_ptr.vmem [resolvable:$true] %s129_s30 }
  0x17   : > { %s118_s4 = scalar_lea.sflag [#allocation3], %s989_s23  ;;  %s774_s5 = scalar_lea.hbm %s996_s28, 1024 }
  0x18   : > { %p775_p0 = scmp.ne.s32.totalorder %s996_s28, %s774_s5  ;;  %p776_p1 = pneg %p1000_p13 }
  0x19   : > { %s779_s8 = scalar_lea.hbm %s1217_s0, 2048  ;;  %p780_p4 = scmp.lt.u32.totalorder %s996_s28, %s1217_s0 }
  0x1a   : > { %p777_p2 = pnand %p776_p1, %p775_p0  ;;  %p781_p5 = scmp.lt.u32.totalorder %s779_s8, %s774_s5 }
  0x1b   : > { %p783_p8 = scmp.lt.u32.totalorder %s774_s5, %s996_s28 }
  0x1c   : > { %p778_p3 = pneg %p777_p2  ;;  %p782_p7 = por %p781_p5, %p780_p4 }
  0x1e   : > { %p784_p10 = por %p783_p8, %p782_p7 }
  0x20   : > { %p785_p9 = pnand %p784_p10, %p778_p3 }
  0x22   : > { %788 = shalt.err (!%p785_p9)
}
  0x23   : > { %s789_s17 = scalar_lea.vmem %s1004_s30, 1024  ;;  %s906_s19 = smov [#allocation2]  }
  0x24   : > { %p790_p0 = scmp.ne.s32.totalorder %s1004_s30, %s789_s17  ;;  %s794_s24 = sshll.u32 %s906_s19, 4  ;;  %s795_s24 = int_to_ptr.vmem [resolvable:$false] %s794_s24 }
  0x25   : > { %s796_s25 = scalar_lea.vmem %s795_s24, 2048  ;;  %p797_p11 = scmp.lt.s32.totalorder %s1004_s30, %s795_s24 }
  0x26   : > { %p792_p2 = pnand %p790_p0, %p776_p1  ;;  %p798_p4 = scmp.lt.s32.totalorder %s796_s25, %s789_s17 }
  0x28   : > { %p793_p12 = pneg %p792_p2  ;;  %p799_p5 = por %p798_p4, %p797_p11 }
  0x2a   : > { %p800_p7 = pnand %p799_p5, %p793_p12 }
  0x2c   : > { %803 = shalt.err (!%p800_p7)
}
  0x2d   : > { %s907_s26 = smov 128   ;;  %s908_s27 = smov 8  }
  0x2e   : > { %720 = dma.hbm_to_vmem [thread:$0]  (!%p1000_p13), %s996_s28, 1024, %s1004_s30, %s118_s4, %s907_s26, %s907_s26, %s908_s27  }
  0x2f   : > { %p696_p9 = scmp.ge.s32.totalorder %s904_s12, 1  ;;  %p156_p3 = scmp.lt.s32.totalorder %s904_s12, 3 }
  0x30   : > { %s693_s29 = sshll.u32 %s989_s23, 5  ;;  %s708_s6 = sshll.u32 %s904_s12, 9 }
  0x31   : > { %p1037_p11 = pnand %p696_p9, %p156_p3  ;;  %s143_s7 = scalar_lea.vmem [#allocation5], %s693_s29 }
  0x32   : > { %s151_s8 = sshll.u32 %s143_s7, 4  ;;  %s1045_s17 = scalar_lea.hbm %s1218_s1, %s708_s6  ;;  %s152_s8 = int_to_ptr.vmem [resolvable:$true] %s151_s8 }
  0x33   : > { %s1227_s5 = scalar_select %p1037_p11, 1, 0 }
  0x34   : > { %s140_s28 = scalar_lea.sflag [#allocation6], %s989_s23  ;;  %s804_s30 = scalar_lea.hbm %s1045_s17, 512 }
  0x35   : > { %p805_p12 = scmp.ne.s32.totalorder %s1045_s17, %s804_s30  ;;  %s809_s24 = scalar_lea.hbm %s1218_s1, 4096 }
  0x36   : > { %p810_p0 = scmp.lt.u32.totalorder %s1045_s17, %s1218_s1  ;;  %p811_p2 = scmp.lt.u32.totalorder %s809_s24, %s804_s30 }
  0x37   : > { %p807_p8 = pnand %p805_p12, %p776_p1  ;;  %p813_p5 = scmp.lt.u32.totalorder %s804_s30, %s1045_s17 }
  0x38   : > { %p812_p4 = por %p811_p2, %p810_p0 }
  0x39   : > { %p808_p10 = pneg %p807_p8 }
  0x3a   : > { %p814_p7 = por %p813_p5, %p812_p4 }
  0x3c   : > { %p815_p9 = pnand %p814_p7, %p808_p10 }
  0x3e   : > { %818 = shalt.err (!%p815_p9)
}
  0x3f   : > { %s819_s23 = scalar_lea.vmem %s152_s8, 512  ;;  %s909_s27 = smov [#allocation5]  }
  0x40   : > { %p820_p3 = scmp.ne.s32.totalorder %s152_s8, %s819_s23  ;;  %s824_s29 = sshll.u32 %s909_s27, 4  ;;  %s825_s29 = int_to_ptr.vmem [resolvable:$false] %s824_s29 }
  0x41   : > { %s826_s6 = scalar_lea.vmem %s825_s29, 1024  ;;  %p827_p6 = scmp.lt.s32.totalorder %s152_s8, %s825_s29 }
  0x42   : > { %p822_p12 = pnand %p820_p3, %p776_p1  ;;  %p828_p11 = scmp.lt.s32.totalorder %s826_s6, %s819_s23 }
  0x44   : > { %p823_p8 = pneg %p822_p12  ;;  %p829_p0 = por %p828_p11, %p827_p6 }
  0x46   : > { %p830_p2 = pnand %p829_p0, %p823_p8 }
  0x48   : > { %833 = shalt.err (!%p830_p2)
}
  0x49   : > { %723 = dma.hbm_to_vmem [thread:$0]  (!%p1000_p13), %s1045_s17, 512, %s152_s8, %s140_s28  }
  0x4a   : > { %p1228_p10 = scmp.ne.s32.totalorder %s1227_s5, 0 }
  0x4b   : > { %s1070_s7 = sand.u32 (!%p1228_p10), 1, %s896_s10   ;;  %p1229_p6 = scmp.ne.s32.totalorder (!%p1228_p10), %s1223_s20, 0 }
  0x4c   : > { %160 = sbr.rel (%p1228_p10) target bundleno = 142 (0x8e), region = 28  ;;  %s697_s14 = sshll.u32 (!%p1228_p10), %s1070_s7, 6 }
  0x4d   : > { %s163_s16 = scalar_lea.sflag (!%p1228_p10), [#allocation3], %s1070_s7  ;;  %s1076_s30 = scalar_lea.vmem (!%p1228_p10), [#allocation2], %s697_s14 }
  0x53   : > { %879 = dma.done.wait (%p1229_p6), %s163_s16, 1024  }
  0x54   : > { %881 = vsyncadd (%p1229_p6), %s163_s16, 4294966272  ;;  %s698_s3 = sshll.u32 %s1070_s7, 5  ;;  %s172_s5 = scalar_lea.sflag [#allocation6], %s1070_s7 }
  0x55   : > { %s175_s8 = scalar_lea.vmem [#allocation5], %s698_s3 }
  0x56   : > { %883 = dma.done.wait (%p1229_p6), %s172_s5, 512  }
  0x57   : > { %885 = vsyncadd (%p1229_p6), %s172_s5, 4294966784  ;;  %v226_v0 = vlaneseq  ;;  %v910_v1 = vmov 1966171168   ;;  %v911_v6 = vmov 1983009808   ;;  %v203_v48 = vld [vmem:[%s1076_s30] sm:$0xff] }
  0x58   : > { %v224_v2 = vunpack.c.l.s4 %v910_v1  ;;  %v418_v7 = vunpack.c.l.s4 %v911_v6  ;;  %v768_v8 = vld [vmem:[%s175_s8] ss:$8 sps:$4 sm:$0xff]   ;;  %v770_v9 = vld [vmem:[%s175_s8 + $0x10] ss:$8 sps:$4 sm:$0xff]   ;;  %v772_v11 = vld [vmem:[%s175_s8 + $0x4] ss:$8 sps:$4 sm:$0xff]  }
  0x59   : > { %v227_v3 = vshrl.u32 %v226_v0, 7  ;;  %v773_v14 = vld [vmem:[%s175_s8 + $0x14] ss:$8 sps:$4 sm:$0xff]   ;;  %v204_v54 = vld [vmem:[%s1076_s30 + $0x8] sm:$0xff]  ;;  %s1126_s20 = scalar_lea.vmem [#allocation7], %s697_s14  ;;  %s710_s28 = sshll.u32 %s951_s13, 10 }
  0x5a   : > { %v225_v4 = vunpack.c.0.s8 %v224_v2  ;;  %v419_v13 = vunpack.c.0.s8 %v418_v7  ;;  %v205_v6 = vld [vmem:[%s1076_s30 + $0x10] sm:$0xff]  ;;  %s590_s17 = sshll.u32 %s1126_s20, 4  ;;  %s1172_s24 = scalar_lea.hbm %s1219_s2, %s710_s28  ;;  %s1167_s17 = int_to_ptr.vmem [resolvable:$true] %s590_s17 }
  0x5b   : > { %v1088_v15 = vsub.s32 0, %v227_v3  ;;  %v1090_v16 = vsub.s32 1, %v227_v3  ;;  %v1092_v17 = vsub.s32 2, %v227_v3  ;;  %v1094_v20 = vsub.s32 3, %v227_v3  ;;  %s576_s25 = scalar_lea.sflag [#allocation4], %s1070_s7  ;;  %s834_s26 = scalar_lea.vmem %s1167_s17, 1024 }
  0x5c   : > { %v228_v5 = vsub.s32 %v225_v4, %v227_v3  ;;  %v1096_v25 = vsub.s32 %v419_v13, %v227_v3  ;;  %p835_p13 = scmp.ne.s32.totalorder %s1167_s17, %s834_s26  ;;  %p1230_p1 = scmp.ne.s32.totalorder %s1224_s21, 0 }
  0x5d   : > { %s912_s13 = smov [#allocation7]  }
  0x5e   : > { %v229_v10 = vrot.slane %v768_v8, %v228_v5  ;;  %v243_v12 = vrot.slane %v770_v9, %v228_v5  ;;  %v236_v18 = vrot.slane %v772_v11, %v228_v5  ;;  %v250_v22 = vrot.slane %v773_v14, %v228_v5  ;;  %p836_p11 = pnand %p835_p13, %p1230_p1  ;;  %s838_s23 = sshll.u32 %s912_s13, 4  ;;  %s839_s23 = int_to_ptr.vmem [resolvable:$false] %s838_s23 }
  0x5f   : > { %s840_s27 = scalar_lea.vmem %s839_s23, 2048  ;;  %p841_p5 = scmp.lt.s32.totalorder %s1167_s17, %s839_s23 }
  0x60   : > { %v251_v19 = vcombine.low %v229_v10, %v243_v12  ;;  %v252_v21 = vcombine.high %v229_v10, %v243_v12  ;;  %v253_v26 = vcombine.low %v236_v18, %v250_v22  ;;  %v254_v27 = vcombine.high %v236_v18, %v250_v22  ;;  %v206_v18 = vld [vmem:[%s1076_s30 + $0x18] sm:$0xff]  ;;  %p837_p4 = pneg %p836_p11  ;;  %p842_p7 = scmp.lt.s32.totalorder %s840_s27, %s834_s26 }
  0x62   : > { %v261_v23 = vrot.slane %v251_v19, %v228_v5  ;;  %v275_v24 = vrot.slane %v252_v21, %v228_v5  ;;  %v268_v42 = vrot.slane %v253_v26, %v228_v5  ;;  %v282_v43 = vrot.slane %v254_v27, %v228_v5  ;;  %p843_p9 = por %p842_p7, %p841_p5 }
  0x64   : > { %v290_v28 = vrot.slane %v261_v23, %v1088_v15  ;;  %v294_v29 = vrot.slane %v261_v23, %v1090_v16  ;;  %v298_v30 = vrot.slane %v261_v23, %v1092_v17  ;;  %v302_v31 = vrot.slane %v261_v23, %v1094_v20  ;;  %p844_p3 = pnand %p843_p9, %p837_p4 }
  0x65   : > { %v306_v32 = vrot.slane %v275_v24, %v1088_v15  ;;  %v310_v33 = vrot.slane %v275_v24, %v1090_v16  ;;  %v314_v34 = vrot.slane %v275_v24, %v1092_v17  ;;  %v318_v35 = vrot.slane %v275_v24, %v1094_v20 }
  0x66   : > { %v415_v36 = vcombine.low %v290_v28, %v294_v29  ;;  %v416_v37 = vcombine.low %v298_v30, %v302_v31  ;;  %v283_v38 = vcombine.high %v261_v23, %v261_v23  ;;  %v285_v39 = vcombine.high %v275_v24, %v275_v24 }
  0x67   : > { %v432_v40 = vcombine.low %v306_v32, %v310_v33  ;;  %v433_v41 = vcombine.low %v314_v34, %v318_v35  ;;  %v354_v1 = vrot.slane %v268_v42, %v1088_v15  ;;  %v358_v5 = vrot.slane %v268_v42, %v1090_v16  ;;  %v207_v34 = vld [vmem:[%s1076_s30 + $0x20] sm:$0xff] }
  0x68   : > { %v423_v44 = vrot.slane %v415_v36, %v1096_v25  ;;  %v430_v45 = vrot.slane %v416_v37, %v1096_v25  ;;  %v322_v46 = vrot.slane %v283_v38, %v1088_v15  ;;  %v326_v47 = vrot.slane %v283_v38, %v1090_v16 }
  0x69   : > { %v440_v49 = vrot.slane %v432_v40, %v1096_v25  ;;  %v447_v50 = vrot.slane %v433_v41, %v1096_v25  ;;  %v330_v51 = vrot.slane %v283_v38, %v1092_v17  ;;  %v334_v52 = vrot.slane %v283_v38, %v1094_v20 }
  0x6a   : > { %v431_v53 = vcombine.low %v423_v44, %v430_v45  ;;  %v449_v55 = vcombine.low %v322_v46, %v326_v47  ;;  %v338_v56 = vrot.slane %v285_v39, %v1088_v15  ;;  %v342_v57 = vrot.slane %v285_v39, %v1090_v16 }
  0x6b   : > { %v448_v58 = vcombine.low %v440_v49, %v447_v50  ;;  %v450_v59 = vcombine.low %v330_v51, %v334_v52  ;;  %v346_v60 = vrot.slane %v285_v39, %v1092_v17  ;;  %v350_v61 = vrot.slane %v285_v39, %v1094_v20 }
  0x6c   : > { %v559_v62 = vadd.f32 %v431_v53, %v203_v48  ;;  %v457_v63 = vrot.slane %v449_v55, %v1096_v25  ;;  %v466_v0 = vcombine.low %v338_v56, %v342_v57  ;;  %v362_v8 = vrot.slane %v268_v42, %v1092_v17  ;;  %v209_v53 = vld [vmem:[%s1076_s30 + $0x30] sm:$0xff] }
  0x6d   : > { %v560_v2 = vadd.f32 %v448_v58, %v204_v54  ;;  %v464_v3 = vrot.slane %v450_v59, %v1096_v25  ;;  %v467_v4 = vcombine.low %v346_v60, %v350_v61  ;;  %v366_v9 = vrot.slane %v268_v42, %v1094_v20 }
  0x6e   : > { %567 = vst [vmem:[%s1126_s20] sm:$0xff] %v559_v62  ;;  %v474_v7 = vrot.slane %v466_v0, %v1096_v25  ;;  %v370_v10 = vrot.slane %v282_v43, %v1088_v15  ;;  %v483_v13 = vcombine.low %v354_v1, %v358_v5  ;;  %v374_v14 = vrot.slane %v282_v43, %v1090_v16 }
  0x6f   : > { %568 = vst [vmem:[%s1126_s20 + $0x8] sm:$0xff] %v560_v2  ;;  %v465_v11 = vcombine.low %v457_v63, %v464_v3  ;;  %v481_v12 = vrot.slane %v467_v4, %v1096_v25  ;;  %v484_v19 = vcombine.low %v362_v8, %v366_v9  ;;  %v378_v21 = vrot.slane %v282_v43, %v1092_v17 }
  0x70   : > { %v382_v22 = vrot.slane %v282_v43, %v1094_v20  ;;  %v284_v23 = vcombine.high %v268_v42, %v268_v42  ;;  %v491_v27 = vrot.slane %v483_v13, %v1096_v25  ;;  %v500_v28 = vcombine.low %v370_v10, %v374_v14  ;;  %v208_v42 = vld [vmem:[%s1076_s30 + $0x28] sm:$0xff] }
  0x71   : > { %v561_v24 = vadd.f32 %v465_v11, %v205_v6  ;;  %v482_v26 = vcombine.low %v474_v7, %v481_v12  ;;  %v498_v29 = vrot.slane %v484_v19, %v1096_v25  ;;  %v286_v41 = vcombine.high %v282_v43, %v282_v43 }
  0x72   : > { %v501_v30 = vcombine.low %v378_v21, %v382_v22  ;;  %v386_v31 = vrot.slane %v284_v23, %v1088_v15  ;;  %v390_v32 = vrot.slane %v284_v23, %v1090_v16  ;;  %v508_v35 = vrot.slane %v500_v28, %v1096_v25 }
  0x73   : > { %569 = vst [vmem:[%s1126_s20 + $0x10] sm:$0xff] %v561_v24  ;;  %v562_v33 = vadd.f32 %v482_v26, %v206_v18  ;;  %v394_v36 = vrot.slane %v284_v23, %v1092_v17  ;;  %v398_v37 = vrot.slane %v284_v23, %v1094_v20  ;;  %v499_v38 = vcombine.low %v491_v27, %v498_v29 }
  0x74   : > { %v515_v39 = vrot.slane %v501_v30, %v1096_v25  ;;  %v517_v40 = vcombine.low %v386_v31, %v390_v32  ;;  %v402_v48 = vrot.slane %v286_v41, %v1088_v15  ;;  %v406_v50 = vrot.slane %v286_v41, %v1090_v16 }
  0x75   : > { %570 = vst [vmem:[%s1126_s20 + $0x18] sm:$0xff] %v562_v33  ;;  %v518_v44 = vcombine.low %v394_v36, %v398_v37  ;;  %v563_v45 = vadd.f32 %v499_v38, %v207_v34  ;;  %v410_v43 = vrot.slane %v286_v41, %v1092_v17  ;;  %v414_v51 = vrot.slane %v286_v41, %v1094_v20  ;;  %v210_v17 = vld [vmem:[%s1076_s30 + $0x38] sm:$0xff] }
  0x76   : > { %v516_v46 = vcombine.low %v508_v35, %v515_v39  ;;  %v525_v47 = vrot.slane %v517_v40, %v1096_v25  ;;  %v534_v55 = vcombine.low %v402_v48, %v406_v50 }
  0x77   : > { %v532_v49 = vrot.slane %v518_v44, %v1096_v25  ;;  %571 = vst [vmem:[%s1126_s20 + $0x20] sm:$0xff] %v563_v45  ;;  %v535_v56 = vcombine.low %v410_v43, %v414_v51 }
  0x78   : > { %v564_v52 = vadd.f32 %v516_v46, %v208_v42  ;;  %v542_v57 = vrot.slane %v534_v55, %v1096_v25 }
  0x79   : > { %v533_v54 = vcombine.low %v525_v47, %v532_v49  ;;  %v549_v16 = vrot.slane %v535_v56, %v1096_v25 }
  0x7a   : > { %572 = vst [vmem:[%s1126_s20 + $0x28] sm:$0xff] %v564_v52 }
  0x7b   : > { %v565_v15 = vadd.f32 %v533_v54, %v209_v53  ;;  %v550_v20 = vcombine.low %v542_v57, %v549_v16 }
  0x7d   : > { %573 = vst [vmem:[%s1126_s20 + $0x30] sm:$0xff] %v565_v15  ;;  %v566_v58 = vadd.f32 %v550_v20, %v210_v17 }
  0x7f   : > { %574 = vst [vmem:[%s1126_s20 + $0x38] sm:$0xff] %v566_v58 }
  0x80   : > { %847 = shalt.err (!%p844_p3)
}
  0x81   : > { %s848_s29 = scalar_lea.hbm %s1172_s24, 1024  ;;  %s852_s16 = scalar_lea.hbm %s1219_s2, 2048 }
  0x82   : > { %p849_p12 = scmp.ne.s32.totalorder %s1172_s24, %s848_s29  ;;  %p853_p2 = scmp.lt.u32.totalorder %s1172_s24, %s1219_s2 }
  0x83   : > { %p854_p10 = scmp.lt.u32.totalorder %s852_s16, %s848_s29  ;;  %p856_p13 = scmp.lt.u32.totalorder %s848_s29, %s1172_s24 }
  0x84   : > { %p850_p8 = pnand %p849_p12, %p1230_p1 }
  0x85   : > { %p855_p6 = por %p854_p10, %p853_p2 }
  0x86   : > { %p851_p0 = pneg %p850_p8 }
  0x87   : > { %p857_p11 = por %p856_p13, %p855_p6 }
  0x89   : > { %p858_p4 = pnand %p857_p11, %p851_p0 }
  0x8b   : > { %861 = shalt.err (!%p858_p4)
}
  0x8c   : > { %s913_s5 = smov 128   ;;  %s914_s8 = smov 8  }
  0x8d   : > { %715 = dma.vmem_to_hbm [thread:$0]  (%p1230_p1), %s1167_s17, 1024, %s1172_s24, %s576_s25, %s913_s5, %s913_s5, %s914_s8  }
  0x8e PF: > { %s605_s20 = sand.u32 1, %s892_s9   ;;  %p1231_p5 = scmp.ne.s32.totalorder %s1225_s22, 0 }
  0x8f   : > { %p1232_p7 = scmp.ge.s32.totalorder %s904_s12, 2  ;;  %s606_s28 = scalar_lea.sflag [#allocation4], %s605_s20 }
  0x91   : > { %p725_p9 = pnand %p1232_p7, %p1231_p5 }
  0x93   : > { %887 = dma.done.wait (!%p725_p9), %s606_s28, 1024  }
  0x94   : > { %889 = vsyncadd (!%p725_p9), %s606_s28, 4294966272  ;;  %p18_p3 = scmp.ge.s32.totalorder %s955_s15, 4   ;;  %s1233_s9 = smov %s896_s10 }
  0x95   : > { %s1234_s10 = smov %s900_s11  ;;  %s1235_s11 = smov %s967_s18 }
  0x96   : > { %s1236_s12 = smov %s955_s15  ;;  %20 = sbr.rel (!%p18_p3) target bundleno = 7 (0x7), region = 86 }
  0x9d   :  { %611 = vsyncpa [#allocation3], 1 }
  0x9e   :  { %613 = vsyncpa [#allocation3 + $0x1], 1 }
  0x9f   :  { %614 = vsyncpa [#allocation6], 1 }
  0xa0   :  { %616 = vsyncpa [#allocation6 + $0x1], 1 }
  0xa1   :  { %617 = vsyncpa [#allocation4], 1 }
  0xa2   :  { %619 = vsyncpa [#allocation4 + $0x1], 1 }

</bundles_post_ra>
